<compile_context>
chip_gen: v7x
topology: tpu7x:2x2x1
jax: 0.10.0
libtpu: 0.0.40
codegen_flags: <defaults>
</compile_context>

<pallas_src>
import functools

import jax
import jax.numpy as jnp
from jax.experimental import pallas as pl
from jax.experimental.pallas import tpu as pltpu


# Tables with at most this many rows use the one-hot MXU gather; larger (but still
# VMEM-resident) tables use a vectorized in-kernel jnp.take.
_ONE_HOT_MAX_ROWS = 2048


def _transe_kernel(idx_ref, ent_ref, rel_ref, out_ref, *,
                   distance: str, tb: int, onehot_ent: bool, onehot_rel: bool):
    idx = idx_ref[...]                               # (tb, 3) int32: [h | r | t]
    ent = ent_ref[...].astype(jnp.float32)           # (N_e, D) resident table
    rel = rel_ref[...].astype(jnp.float32)           # (N_r, D) resident table

    def gather(table, col, use_onehot):
        n = table.shape[0]
        if use_onehot:
            # One-hot MXU gather: (tb, n) one-hot @ (n, D) table -> (tb, D).
            iv = idx[:, col:col + 1]                                   # (tb, 1)
            ids = jax.lax.broadcasted_iota(jnp.int32, (tb, n), 1)      # (tb, n)
            onehot = (iv == ids).astype(jnp.float32)                   # (tb, n)
            return jnp.dot(onehot, table, preferred_element_type=jnp.float32)
        # Fallback for larger VMEM-resident tables: tile-wide vectorized gather.
        return jnp.take(table, idx[:, col], axis=0)

    h_s = gather(ent, 0, onehot_ent)                  # (tb, D) f32
    r_s = gather(rel, 1, onehot_rel)                  # (tb, D) f32
    t_s = gather(ent, 2, onehot_ent)                  # (tb, D) f32

    s = h_s + r_s - t_s                               # fused VPU elementwise
    if distance == "L1":
        e = jnp.sum(jnp.abs(s), axis=-1)              # (tb,)  XLU reduce
    else:  # L2
        e = jnp.sqrt(jnp.sum(s * s, axis=-1))         # (tb,)

    out_ref[...] = e.reshape(1, tb).astype(out_ref.dtype)   # lane-dense (1, tb) store


def transe_forward(entity_emb, relation_emb, h, r, t, *, distance="L1", block_b=512):
    """Pallas equivalent of TransE.forward(h, r, t) -> energy of shape (B,)."""
    B = int(h.shape[0])
    N_e, D = entity_emb.shape
    N_r, D_r = relation_emb.shape
    assert D == D_r, "entity/relation embedding dims must match"

    # Tile size: multiple of 128, capped at block_b, shrunk for small batches.
    tb = min(int(block_b), max(128, ((B + 127) // 128) * 128))
    tb = ((tb + 127) // 128) * 128
    num_tiles = pl.cdiv(B, tb)
    b_pad = num_tiles * tb

    def _pad_idx(x):
        x = x.astype(jnp.int32)
        if b_pad != B:
            x = jnp.pad(x, (0, b_pad - B))    # pads with index 0 (valid row; discarded)
        return x

    # Pack h/r/t into one (B_pad, 3) array; streamed per tile as a (tb, 3) VMEM block.
    idx = jnp.stack([_pad_idx(h), _pad_idx(r), _pad_idx(t)], axis=1)   # (b_pad, 3)

    kernel = functools.partial(
        _transe_kernel,
        distance=distance,
        tb=tb,
        onehot_ent=(N_e <= _ONE_HOT_MAX_ROWS),
        onehot_rel=(N_r <= _ONE_HOT_MAX_ROWS),
    )

    # VMEM budget from actual dtypes / block sizes (+ headroom for intermediates).
    ent_bytes = int(entity_emb.size) * entity_emb.dtype.itemsize
    rel_bytes = int(relation_emb.size) * relation_emb.dtype.itemsize
    vmem_needed = (
        2 * (ent_bytes + rel_bytes)               # resident tables (double-buffered)
        + 2 * (tb * 3 * 4)                        # per-tile index blocks
        + 2 * (tb * 4)                            # per-tile output blocks
        + 3 * tb * (max(N_e, N_r) + D) * 4        # one-hot / gathered f32 intermediates
        + (2 << 20)                               # headroom
    )
    vmem_limit = max(int(vmem_needed), 32 * 1024 * 1024)

    out = pl.pallas_call(
        kernel,
        out_shape=jax.ShapeDtypeStruct((1, b_pad), jnp.float32),
        grid_spec=pltpu.PrefetchScalarGridSpec(
            num_scalar_prefetch=0,
            grid=(num_tiles,),                    # TB triples per grid step
            in_specs=[
                # Per-tile triple indices: (tb, 3) block, pipelined with compute.
                pl.BlockSpec((tb, 3), lambda i: (i, 0)),
                # Entity table: full-array block, constant index -> VMEM-resident.
                pl.BlockSpec((N_e, D), lambda i: (0, 0)),
                # Relation table: likewise resident.
                pl.BlockSpec((N_r, D), lambda i: (0, 0)),
            ],
            out_specs=pl.BlockSpec((1, tb), lambda i: (0, i)),   # lane-dense slab
        ),
        compiler_params=pltpu.CompilerParams(
            dimension_semantics=("parallel",),
            vmem_limit_bytes=vmem_limit,
        ),
    )(idx, entity_emb, relation_emb)

    return out.reshape(-1)[:B]                    # (B,) — matches torch.norm(..., dim=1)


def init_transe_params(key, n_entities, n_relations, embedding_dim):
    """Deterministic init matching the PyTorch __init__ semantics."""
    bound = 6.0 / jnp.sqrt(jnp.float32(embedding_dim))
    k_e, k_r = jax.random.split(key)
    entity_emb = jax.random.uniform(
        k_e, (n_entities, embedding_dim), jnp.float32, -bound, bound)
    relation_emb = jax.random.uniform(
        k_r, (n_relations, embedding_dim), jnp.float32, -bound, bound)
    # F.normalize(p=2, dim=1) on entity embeddings
    norm = jnp.maximum(jnp.linalg.norm(entity_emb, axis=1, keepdims=True), 1e-12)
    entity_emb = entity_emb / norm
    return entity_emb, relation_emb


if __name__ == "__main__":
    n_entities, n_relations, embedding_dim = 64, 16, 128
    batch = 8

    key = jax.random.PRNGKey(0)
    k_params, k_h, k_r, k_t = jax.random.split(key, 4)

    entity_emb, relation_emb = init_transe_params(
        k_params, n_entities, n_relations, embedding_dim)

    h = jax.random.randint(k_h, (batch,), 0, n_entities, dtype=jnp.int32)
    r = jax.random.randint(k_r, (batch,), 0, n_relations, dtype=jnp.int32)
    t = jax.random.randint(k_t, (batch,), 0, n_entities, dtype=jnp.int32)

    # Pure-JAX reference (same semantics as the PyTorch forward).
    score_ref = entity_emb[h] + relation_emb[r] - entity_emb[t]
    energy_l1_ref = jnp.sum(jnp.abs(score_ref), axis=1)
    energy_l2_ref = jnp.sqrt(jnp.sum(score_ref * score_ref, axis=1))

    energy_l1 = jax.block_until_ready(
        transe_forward(entity_emb, relation_emb, h, r, t, distance="L1"))
    energy_l2 = jax.block_until_ready(
        transe_forward(entity_emb, relation_emb, h, r, t, distance="L2"))

    assert energy_l1.shape == (batch,)
    assert energy_l2.shape == (batch,)
    assert jnp.allclose(energy_l1, energy_l1_ref, atol=1e-4, rtol=1e-4)
    assert jnp.allclose(energy_l2, energy_l2_ref, atol=1e-4, rtol=1e-4)

    print("KERNEL_OK")
</pallas_src>

<mosaic_0001>
module attributes {stable_mosaic.version = 11 : i64} {
  func.func @_transe_kernel(%arg0: i32, %arg1: memref<128x3xi32, #tpu.memory_space<vmem>>, %arg2: memref<64x128xf32, #tpu.memory_space<vmem>>, %arg3: memref<16x128xf32, #tpu.memory_space<vmem>>, %arg4: memref<1x128xf32, #tpu.memory_space<vmem>>) attributes {dimension_semantics = [#tpu.dimension_semantics<parallel>], iteration_bounds = array<i64: 1>, scalar_prefetch = 0 : i64, scratch_operands = 0 : i64, tpu.core_type = #tpu.core_type<tc>, window_params = [{transform_indices = @transform_0, window_bounds = array<i64: 128, 3>}, {pipeline_mode = #tpu.pipeline_mode<synchronous>, transform_indices = @transform_1, window_bounds = array<i64: 64, 128>}, {pipeline_mode = #tpu.pipeline_mode<synchronous>, transform_indices = @transform_2, window_bounds = array<i64: 16, 128>}, {transform_indices = @transform_3, window_bounds = array<i64: 1, 128>}]} {
    %c0 = arith.constant 0 : index
    %c0_0 = arith.constant 0 : index
    %0 = vector.load %arg1[%c0, %c0_0] : memref<128x3xi32, #tpu.memory_space<vmem>>, vector<128x3xi32>
    %c0_1 = arith.constant 0 : index
    %c0_2 = arith.constant 0 : index
    %1 = vector.load %arg2[%c0_1, %c0_2] : memref<64x128xf32, #tpu.memory_space<vmem>>, vector<64x128xf32>
    %c0_3 = arith.constant 0 : index
    %c0_4 = arith.constant 0 : index
    %2 = vector.load %arg3[%c0_3, %c0_4] : memref<16x128xf32, #tpu.memory_space<vmem>>, vector<16x128xf32>
    %3 = vector.extract_strided_slice %0 {offsets = [0, 0], sizes = [128, 1], strides = [1, 1]} : vector<128x3xi32> to vector<128x1xi32>
    %4 = tpu.iota {dimensions = array<i32: 1>} : vector<128x64xi32>
    %5 = vector.broadcast %3 : vector<128x1xi32> to vector<128x64xi32>
    %6 = arith.cmpi eq, %5, %4 : vector<128x64xi32>
    %7 = arith.extui %6 : vector<128x64xi1> to vector<128x64xi32>
    %8 = arith.sitofp %7 : vector<128x64xi32> to vector<128x64xf32>
    %cst = arith.constant dense<0.000000e+00> : vector<128x128xf32>
    %9 = tpu.matmul %8, %1, %cst {dimension_numbers = #tpu.dot_dimension_numbers<[1], [0], [0], [1], [0, 0, 1, 1], [], []>} : vector<128x64xf32>, vector<64x128xf32>, vector<128x128xf32> -> vector<128x128xf32>
    %10 = vector.extract_strided_slice %0 {offsets = [0, 1], sizes = [128, 1], strides = [1, 1]} : vector<128x3xi32> to vector<128x1xi32>
    %11 = tpu.iota {dimensions = array<i32: 1>} : vector<128x16xi32>
    %12 = vector.broadcast %10 : vector<128x1xi32> to vector<128x16xi32>
    %13 = arith.cmpi eq, %12, %11 : vector<128x16xi32>
    %14 = arith.extui %13 : vector<128x16xi1> to vector<128x16xi32>
    %15 = arith.sitofp %14 : vector<128x16xi32> to vector<128x16xf32>
    %cst_5 = arith.constant dense<0.000000e+00> : vector<128x128xf32>
    %16 = tpu.matmul %15, %2, %cst_5 {dimension_numbers = #tpu.dot_dimension_numbers<[1], [0], [0], [1], [0, 0, 1, 1], [], []>} : vector<128x16xf32>, vector<16x128xf32>, vector<128x128xf32> -> vector<128x128xf32>
    %17 = vector.extract_strided_slice %0 {offsets = [0, 2], sizes = [128, 1], strides = [1, 1]} : vector<128x3xi32> to vector<128x1xi32>
    %18 = tpu.iota {dimensions = array<i32: 1>} : vector<128x64xi32>
    %19 = vector.broadcast %17 : vector<128x1xi32> to vector<128x64xi32>
    %20 = arith.cmpi eq, %19, %18 : vector<128x64xi32>
    %21 = arith.extui %20 : vector<128x64xi1> to vector<128x64xi32>
    %22 = arith.sitofp %21 : vector<128x64xi32> to vector<128x64xf32>
    %cst_6 = arith.constant dense<0.000000e+00> : vector<128x128xf32>
    %23 = tpu.matmul %22, %1, %cst_6 {dimension_numbers = #tpu.dot_dimension_numbers<[1], [0], [0], [1], [0, 0, 1, 1], [], []>} : vector<128x64xf32>, vector<64x128xf32>, vector<128x128xf32> -> vector<128x128xf32>
    %24 = arith.addf %9, %16 : vector<128x128xf32>
    %25 = arith.subf %24, %23 : vector<128x128xf32>
    %26 = math.absf %25 : vector<128x128xf32>
    %cst_7 = arith.constant dense<0.000000e+00> : vector<128xf32>
    %27 = vector.multi_reduction <add>, %26, %cst_7 [1] : vector<128x128xf32> to vector<128xf32>
    %28 = vector.shape_cast %27 : vector<128xf32> to vector<1x128xf32>
    %c0_8 = arith.constant 0 : index
    %c0_9 = arith.constant 0 : index
    %29 = vector.load %arg4[%c0_8, %c0_9] : memref<1x128xf32, #tpu.memory_space<vmem>>, vector<1x128xf32>
    tpu.vector_store %arg4[%c0_8, %c0_9], %28 {strides = array<i32>} : memref<1x128xf32, #tpu.memory_space<vmem>>, vector<1x128xf32>,
    return
  }
  func.func @transform_0(%arg0: i32) -> (i32, i32) {
    %c0_i32 = arith.constant 0 : i32
    %c0_i32_0 = arith.constant 0 : i32
    return %arg0, %c0_i32 : i32, i32
  }
  func.func @transform_1(%arg0: i32) -> (i32, i32) {
    %c0_i32 = arith.constant 0 : i32
    %c0_i32_0 = arith.constant 0 : i32
    %c0_i32_1 = arith.constant 0 : i32
    return %c0_i32, %c0_i32_0 : i32, i32
  }
  func.func @transform_2(%arg0: i32) -> (i32, i32) {
    %c0_i32 = arith.constant 0 : i32
    %c0_i32_0 = arith.constant 0 : i32
    %c0_i32_1 = arith.constant 0 : i32
    return %c0_i32, %c0_i32_0 : i32, i32
  }
  func.func @transform_3(%arg0: i32) -> (i32, i32) {
    %c0_i32 = arith.constant 0 : i32
    %c0_i32_0 = arith.constant 0 : i32
    return %c0_i32, %arg0 : i32, i32
  }
}

</mosaic_0001>

<bundles_post_ra>
// kernel: tpu_custom_call.1
= control target key start
LH: loop header
LB: loop body
LE: loop exit
PB: predicated region body
PF: predicated region fallthrough
CT: control target
= control target key end

     0   :  { %v1490_v2 = vmov 1   ;;  %s1823_s0 = inlined_call_operand.vmem [shape: s32[128,3], index: 0, kind: input, shape index: {}]   ;;  %s1824_s1 = inlined_call_operand.vmem [shape: f32[64,128], index: 1, kind: input, shape index: {}]   ;;  %s1825_s2 = inlined_call_operand.vmem [shape: f32[16,128], index: 2, kind: input, shape index: {}]   ;;  %s1826_s3 = inlined_call_operand.hbm [shape: f32[1,128], index: 3, kind: output, shape index: {}]  }
   0x1   :  { %v1518_v0 = vld [vmem:[%s1823_s0 + $0x40] sm:$0xff]  ;;  %1447 = vset.pattern.permute.xlu1 %v1490_v2  ;;  %1446 = vset.pattern.permute.xlu0 %v1490_v2  ;;  %v1527_v3 = vld [vmem:[%s1823_s0 + $0x48] sm:$0xff] }
   0x2   :  { %v15_v1 = vld [vmem:[%s1823_s0] sm:$0xff]  ;;  %164 = vperm.xlu1 %1447, %v1518_v0   ;;  %v16_v4 = vld [vmem:[%s1823_s0 + $0x8] sm:$0xff] }
   0x3   :  { %140 = vperm.xlu0 %1446, %v15_v1   ;;  %v39_v5 = vld [vmem:[%s1825_s2] sm:$0xff]  ;;  %v40_v6 = vld [vmem:[%s1825_s2 + $0x8] sm:$0xff] }
   0x4   :  { %v1387_v7 = vpack.c.bf16 %v40_v6, %v39_v5 }
   0x6   :  { %167 = vperm.xlu1 %1447, %v1527_v3  }
   0x7   :  { %143 = vperm.xlu0 %1446, %v16_v4  }
   0x8   :  { %8 = vsyncpa [#allocation3], 0  ;;  %v18_v8 = vld [vmem:[%s1823_s0 + $0x18] sm:$0xff]  ;;  %v17_v9 = vld [vmem:[%s1823_s0 + $0x10] sm:$0xff]  ;;  %1423 = vmatprep.subr.bf16.mxu1 %v1387_v7  ;;  %1388 = vmatprep.subr.bf16.mxu0 %v1387_v7  ;;  %v1491_v23 = vmov 0   ;;  %v1492_v24 = vmov 2   ;;  %v41_v25 = vlaneseq }
   0x9   :  { %1424 = vmatpush3.bf16.msra.mxu1 %v1387_v7  ;;  %1390 = vmatpush3.bf16.msra.mxu0 %v1387_v7  ;;  %v1548_v10 = vld [vmem:[%s1823_s0 + $0x58] sm:$0xff]  ;;  %v25_v11 = vld [vmem:[%s1823_s0 + $0x50] sm:$0xff]  ;;  %v20_v12 = vld [vmem:[%s1823_s0 + $0x28] sm:$0xff]  ;;  %vm235_vm0 = vcmask 130048   ;;  %v1493_v29 = vmov 0.0  }
   0xa   :  { %149 = vperm.xlu1 %1447, %v18_v8   ;;  %v19_v13 = vld [vmem:[%s1823_s0 + $0x20] sm:$0xff]  ;;  %v28_v14 = vld [vmem:[%s1823_s0 + $0x68] sm:$0xff]  ;;  %v22_v19 = vld [vmem:[%s1823_s0 + $0x38] sm:$0xff]  ;;  %v1595_v26 = vand.u32 127, %v41_v25 }
   0xb   :  { %146 = vperm.xlu0 %1446, %v17_v9   ;;  %v27_v15 = vld [vmem:[%s1823_s0 + $0x60] sm:$0xff]  ;;  %v32_v17 = vld [vmem:[%s1824_s1 + $0x8] sm:$0xff]  ;;  %v21_v20 = vld [vmem:[%s1823_s0 + $0x30] sm:$0xff] }
   0xc   :  { %v31_v16 = vld [vmem:[%s1824_s1] sm:$0xff]  ;;  %v30_v21 = vld [vmem:[%s1823_s0 + $0x78] sm:$0xff]  ;;  %v29_v22 = vld [vmem:[%s1823_s0 + $0x70] sm:$0xff] }
   0xd   :  { %v1572_v18 = vpack.c.bf16 %v32_v17, %v31_v16  ;;  %v33_v32 = vld [vmem:[%s1824_s1 + $0x10] sm:$0xff]  ;;  %v34_v33 = vld [vmem:[%s1824_s1 + $0x18] sm:$0xff]  ;;  %v35_v39 = vld [vmem:[%s1824_s1 + $0x20] sm:$0xff] }
   0xe   :  { %173 = vperm.xlu1 %1447, %v1548_v10   ;;  %v1395_v36 = vpack.c.bf16 %v34_v33, %v33_v32  ;;  %v36_v40 = vld [vmem:[%s1824_s1 + $0x28] sm:$0xff]  ;;  %v37_v46 = vld [vmem:[%s1824_s1 + $0x30] sm:$0xff]  ;;  %v38_v47 = vld [vmem:[%s1824_s1 + $0x38] sm:$0xff]  ;;  %s1494_s1 = smov [#allocation2]  }
   0xf   :  { %170 = vperm.xlu0 %1446, %v25_v11   ;;  %1408 = vmatprep.subr.bf16.mxu0 %v1572_v18  ;;  %v1399_v45 = vpack.c.bf16 %v36_v40, %v35_v39  ;;  %v1403_v52 = vpack.c.bf16 %v38_v47, %v37_v46  ;;  %s1109_s7 = sshll.u32 %s1494_s1, 4  ;;  %s1110_s7 = int_to_ptr.vmem [resolvable:$true] %s1109_s7 }
  0x10   :  { %1392 = vmatprep.subr.bf16.mxu1 %v1572_v18  ;;  %s1466_s8 = scalar_lea.vmem %s1110_s7, 16  ;;  %s1470_s9 = scalar_lea.vmem %s1110_s7, 32 }
  0x11   :  { %p1467_p0 = scmp.ne.s32.totalorder %s1110_s7, %s1466_s8  ;;  %p1471_p1 = scmp.lt.s32.totalorder %s1110_s7, %s1110_s7 }
  0x12   :  { %155 = vperm.xlu1 %1447, %v20_v12   ;;  %p1472_p2 = scmp.lt.s32.totalorder %s1470_s9, %s1466_s8 }
  0x13   :  { %152 = vperm.xlu0 %1446, %v19_v13  }
  0x14   :  { %p1473_p3 = por %p1472_p2, %p1471_p1 }
  0x16   :  { %179 = vperm.xlu1 %1447, %v28_v14   ;;  %p1474_p4 = pnand %p1473_p3, %p1467_p0 }
  0x17   :  { %176 = vperm.xlu0 %1446, %v27_v15  }
  0x1a   :  { %161 = vperm.xlu1 %1447, %v22_v19  }
  0x1b   :  { %158 = vperm.xlu0 %1446, %v21_v20  }
  0x1e   :  { %185 = vperm.xlu1 %1447, %v30_v21  }
  0x1f   :  { %182 = vperm.xlu0 %1446, %v29_v22  }
  0x22   :  { %1449 = vset.pattern.permute.xlu1 %v1491_v23 }
  0x23   :  { %1448 = vset.pattern.permute.xlu0 %v1491_v23  ;;  %47 = vperm.xlu1 %1449, %v16_v4  }
  0x24   :  { %44 = vperm.xlu0 %1448, %v15_v1  }
  0x27   :  { %1450 = vset.pattern.permute.xlu1 %v1492_v24 }
  0x28   :  { %56 = vperm.xlu0 %1448, %v19_v13   ;;  %430 = vperm.xlu1 %1450, %v15_v1  }
  0x2c   :  { %68 = vperm.xlu0 %1448, %v1518_v0   ;;  %1451 = vset.pattern.permute.xlu1 %v1491_v23 }
  0x2d   :  { %50 = vperm.xlu1 %1451, %v17_v9  }
  0x30   :  { %80 = vperm.xlu0 %1448, %v27_v15  }
  0x31   :  { %53 = vperm.xlu1 %1451, %v18_v8  }
  0x34   :  { %1461 = vset.pattern.permute.xlu0 %v1492_v24 }
  0x35   :  { %433 = vperm.xlu0 %1461, %v16_v4   ;;  %1452 = vset.pattern.permute.xlu1 %v1492_v24 }
  0x36   :  { %439 = vperm.xlu1 %1452, %v18_v8  }
  0x39   :  { %436 = vperm.xlu0 %1461, %v17_v9  }
  0x3a   :  { %1453 = vset.pattern.permute.xlu1 %v1491_v23 }
  0x3b   :  { %59 = vperm.xlu1 %1453, %v20_v12  }
  0x3d   :  { %445 = vperm.xlu0 %1461, %v20_v12  }
  0x3f   :  { %1454 = vset.pattern.permute.xlu1 %v1492_v24 }
  0x40   :  { %442 = vperm.xlu1 %1454, %v19_v13  }
  0x41   :  { %448 = vperm.xlu0 %1461, %v21_v20  }
  0x44   :  { %1455 = vset.pattern.permute.xlu1 %v1491_v23 }
  0x45   :  { %457 = vperm.xlu0 %1461, %v1527_v3   ;;  %62 = vperm.xlu1 %1455, %v21_v20  }
  0x49   :  { %460 = vperm.xlu0 %1461, %v25_v11   ;;  %65 = vperm.xlu1 %1455, %v22_v19  }
  0x4d   :  { %469 = vperm.xlu0 %1461, %v28_v14   ;;  %1456 = vset.pattern.permute.xlu1 %v1492_v24 }
  0x4e   :  { %451 = vperm.xlu1 %1456, %v22_v19  }
  0x51   :  { %472 = vperm.xlu0 %1461, %v29_v22  }
  0x52   :  { %1457 = vset.pattern.permute.xlu1 %v1491_v23 }
  0x53   :  { %71 = vperm.xlu1 %1457, %v1527_v3  }
  0x57   :  { %1458 = vset.pattern.permute.xlu1 %v1492_v24 }
  0x58   :  { %454 = vperm.xlu1 %1458, %v1518_v0  }
  0x5c   :  { %1459 = vset.pattern.permute.xlu1 %v1491_v23 }
  0x5d   :  { %74 = vperm.xlu1 %1459, %v25_v11  }
  0x61   :  { %77 = vperm.xlu1 %1459, %v1548_v10  }
  0x65   :  { %1460 = vset.pattern.permute.xlu1 %v1492_v24 }
  0x66   :  { %463 = vperm.xlu1 %1460, %v1548_v10  }
  0x6a   :  { %1462 = vset.pattern.permute.xlu1 %v1491_v23 }
  0x6b   :  { %83 = vperm.xlu1 %1462, %v28_v14  }
  0x6f   :  { %1463 = vset.pattern.permute.xlu1 %v1492_v24 }
  0x70   :  { %466 = vperm.xlu1 %1463, %v27_v15  }
  0x74   :  { %1464 = vset.pattern.permute.xlu1 %v1491_v23 }
  0x75   :  { %86 = vperm.xlu1 %1464, %v29_v22  }
  0x79   :  { %89 = vperm.xlu1 %1464, %v30_v21  }
  0x7d   :  { %1465 = vset.pattern.permute.xlu1 %v1492_v24 }
  0x7e   :  { %475 = vperm.xlu1 %1465, %v30_v21  }
  0x81   :  { %v165_v27 = vpop.permute.xlu1 %164 }
  0x82   :  { %v141_v28 = vpop.permute.xlu0 %140  ;;  %vm195_vm1 = vcmp.eq.s32.totalorder %v165_v27, %v1595_v26 }
  0x83   :  { %vm187_vm2 = vcmp.eq.s32.totalorder %v141_v28, %v1595_v26  ;;  %v1141_v30 = vsel %vm195_vm1, 1.0, %v1493_v29 }
  0x84   :  { %v1133_v31 = vsel %vm187_vm2, 1.0, %v1493_v29  ;;  %1295 = vmatprep.mubr.msk.f32.mxu1 %vm235_vm0, %v1141_v30  ;;  %vm525_vm2 = vcmask 523264  }
  0x85   :  { %1283 = vmatprep.mubr.msk.f32.mxu0 %vm235_vm0, %v1133_v31  ;;  %v168_v34 = vpop.permute.xlu1 %167 }
  0x86   :  { %v144_v35 = vpop.permute.xlu0 %143  ;;  %vm196_vm3 = vcmp.eq.s32.totalorder %v168_v34, %v1595_v26 }
  0x87   :  { %vm188_vm4 = vcmp.eq.s32.totalorder %v144_v35, %v1595_v26  ;;  %v1142_v37 = vsel %vm196_vm3, 1.0, %v1493_v29 }
  0x88   :  { %v1134_v38 = vsel %vm188_vm4, 1.0, %v1493_v29  ;;  %1296 = vmatmul.mubr.msk.f32.vlgmr.msra.gmra.mrb[0].mxu1 %vm235_vm0, %v1142_v37 }
  0x89   :  { %1284 = vmatmul.mubr.msk.f32.vlgmr.msra.gmra.mrb[0].mxu0 %vm235_vm0, %v1134_v38  ;;  %v150_v41 = vpop.permute.xlu1 %149  ;;  %1394 = vmatpush3.bf16.msra.mxu1 %v1572_v18 }
  0x8a   :  { %v147_v42 = vpop.permute.xlu0 %146  ;;  %1410 = vmatpush3.bf16.msra.mxu0 %v1572_v18  ;;  %vm190_vm5 = vcmp.eq.s32.totalorder %v150_v41, %v1595_v26  ;;  %1396 = vmatprep.subr.bf16.mxu1 %v1395_v36 }
  0x8b   :  { %vm189_vm6 = vcmp.eq.s32.totalorder %v147_v42, %v1595_v26  ;;  %1412 = vmatprep.subr.bf16.mxu0 %v1395_v36  ;;  %v1136_v43 = vsel %vm190_vm5, 1.0, %v1493_v29 }
  0x8c   :  { %v1135_v44 = vsel %vm189_vm6, 1.0, %v1493_v29 }
  0x8d   :  { %1286 = vmatprep.mubr.msk.f32.mxu0 %vm235_vm0, %v1135_v44  ;;  %v174_v48 = vpop.permute.xlu1 %173  ;;  %1398 = vmatpush3.bf16.msra.mxu1 %v1395_v36 }
  0x8e   :  { %1287 = vmatmul.mubr.msk.f32.gmra.mrb[2].mxu0 %vm235_vm0, %v1136_v43  ;;  %v171_v49 = vpop.permute.xlu0 %170  ;;  %vm198_vm7 = vcmp.eq.s32.totalorder %v174_v48, %v1595_v26  ;;  %1400 = vmatprep.subr.bf16.mxu1 %v1399_v45 }
  0x8f   :  { %vm197_vm8 = vcmp.eq.s32.totalorder %v171_v49, %v1595_v26  ;;  %1414 = vmatpush3.bf16.msra.mxu0 %v1395_v36  ;;  %v1144_v50 = vsel %vm198_vm7, 1.0, %v1493_v29 }
  0x90   :  { %v1143_v51 = vsel %vm197_vm8, 1.0, %v1493_v29  ;;  %1416 = vmatprep.subr.bf16.mxu0 %v1399_v45 }
  0x91   :  { %1298 = vmatprep.mubr.msk.f32.mxu1 %vm235_vm0, %v1143_v51  ;;  %v156_v53 = vpop.permute.xlu1 %155  ;;  %1402 = vmatpush3.bf16.msra.mxu1 %v1399_v45 }
  0x92   :  { %1299 = vmatmul.mubr.msk.f32.gmra.mrb[2].mxu1 %vm235_vm0, %v1144_v50  ;;  %v153_v54 = vpop.permute.xlu0 %152  ;;  %vm192_vm9 = vcmp.eq.s32.totalorder %v156_v53, %v1595_v26  ;;  %1404 = vmatprep.subr.bf16.mxu1 %v1403_v52 }
  0x93   :  { %vm191_vm10 = vcmp.eq.s32.totalorder %v153_v54, %v1595_v26  ;;  %1418 = vmatpush3.bf16.msra.mxu0 %v1399_v45  ;;  %v1138_v55 = vsel %vm192_vm9, 1.0, %v1493_v29 }
  0x94   :  { %v1137_v56 = vsel %vm191_vm10, 1.0, %v1493_v29  ;;  %1420 = vmatprep.subr.bf16.mxu0 %v1403_v52 }
  0x95   :  { %1289 = vmatprep.mubr.msk.f32.mxu0 %vm235_vm0, %v1137_v56  ;;  %v180_v57 = vpop.permute.xlu1 %179  ;;  %1406 = vmatpush3.bf16.msra.mxu1 %v1403_v52 }
  0x96   :  { %1290 = vmatmul.mubr.msk.f32.gmra.mrb[4].mxu0 %vm235_vm0, %v1138_v55  ;;  %v177_v58 = vpop.permute.xlu0 %176  ;;  %vm200_vm11 = vcmp.eq.s32.totalorder %v180_v57, %v1595_v26 }
  0x97   :  { %vm199_vm12 = vcmp.eq.s32.totalorder %v177_v58, %v1595_v26  ;;  %1422 = vmatpush3.bf16.msra.mxu0 %v1403_v52  ;;  %v1146_v59 = vsel %vm200_vm11, 1.0, %v1493_v29 }
  0x98   :  { %v1145_v60 = vsel %vm199_vm12, 1.0, %v1493_v29 }
  0x99   :  { %1301 = vmatprep.mubr.msk.f32.mxu1 %vm235_vm0, %v1145_v60  ;;  %v162_v61 = vpop.permute.xlu1 %161 }
  0x9a   :  { %1302 = vmatmul.mubr.msk.f32.gmra.mrb[4].mxu1 %vm235_vm0, %v1146_v59  ;;  %v159_v62 = vpop.permute.xlu0 %158  ;;  %vm194_vm13 = vcmp.eq.s32.totalorder %v162_v61, %v1595_v26 }
  0x9b   :  { %vm193_vm14 = vcmp.eq.s32.totalorder %v159_v62, %v1595_v26  ;;  %v1140_v63 = vsel %vm194_vm13, 1.0, %v1493_v29 }
  0x9c   :  { %v1139_v0 = vsel %vm193_vm14, 1.0, %v1493_v29 }
  0x9d   :  { %1292 = vmatprep.mubr.msk.f32.mxu0 %vm235_vm0, %v1139_v0  ;;  %v186_v1 = vpop.permute.xlu1 %185 }
  0x9e   :  { %1293 = vmatmul.mubr.msk.f32.gmra.mrb[6].mxu0 %vm235_vm0, %v1140_v63  ;;  %v183_v2 = vpop.permute.xlu0 %182  ;;  %vm202_vm15 = vcmp.eq.s32.totalorder %v186_v1, %v1595_v26 }
  0x9f   :  { %vm201_vm1 = vcmp.eq.s32.totalorder %v183_v2, %v1595_v26  ;;  %v1148_v3 = vsel %vm202_vm15, 1.0, %v1493_v29 }
  0xa0   :  { %v1147_v4 = vsel %vm201_vm1, 1.0, %v1493_v29 }
  0xa1   :  { %1304 = vmatprep.mubr.msk.f32.mxu1 %vm235_vm0, %v1147_v4 }
  0xa2   :  { %1305 = vmatmul.mubr.msk.f32.gmra.mrb[6].mxu1 %vm235_vm0, %v1148_v3  ;;  %v48_v5 = vpop.permute.xlu1 %47 }
  0xa3   :  { %v45_v6 = vpop.permute.xlu0 %44  ;;  %vm92_vm3 = vcmp.eq.s32.totalorder %v48_v5, %v1595_v26 }
  0xa4   :  { %vm91_vm4 = vcmp.eq.s32.totalorder %v45_v6, %v1595_v26  ;;  %v1118_v7 = vsel %vm92_vm3, 1.0, %v1493_v29 }
  0xa5   :  { %v1117_v8 = vsel %vm91_vm4, 1.0, %v1493_v29 }
  0xa6   :  { %1363 = vmatprep.mubr.msk.f32.mxu0 %vm525_vm2, %v1117_v8 }
  0xa7   :  { %1364 = vmatmul.mubr.msk.f32.vlgmr.msra.gmra.mrb[0].mxu0 %vm525_vm2, %v1118_v7  ;;  %v57_v9 = vpop.permute.xlu0 %56  ;;  %v431_v10 = vpop.permute.xlu1 %430 }
  0xa8   :  { %vm477_vm5 = vcmp.eq.s32.totalorder %v431_v10, %v1595_v26  ;;  %vm95_vm6 = vcmp.eq.s32.totalorder %v57_v9, %v1595_v26 }
  0xa9   :  { %v1165_v11 = vsel %vm477_vm5, 1.0, %v1493_v29  ;;  %v1121_v17 = vsel %vm95_vm6, 1.0, %v1493_v29 }
  0xaa   :  { %1323 = vmatprep.mubr.msk.f32.mxu1 %vm525_vm2, %v1165_v11 }
  0xab   :  { %v69_v12 = vpop.permute.xlu0 %68 }
  0xac   :  { %v51_v13 = vpop.permute.xlu1 %50  ;;  %vm99_vm1 = vcmp.eq.s32.totalorder %v69_v12, %v1595_v26 }
  0xad   :  { %vm93_vm0 = vcmp.eq.s32.totalorder %v51_v13, %v1595_v26  ;;  %v1125_v39 = vsel %vm99_vm1, 1.0, %v1493_v29 }
  0xae   :  { %v1119_v14 = vsel %vm93_vm0, 1.0, %v1493_v29 }
  0xaf   :  { %v1677_v15 = vpop.permute.xlu0 %80  ;;  %1366 = vmatprep.mubr.msk.f32.mxu0 %vm525_vm2, %v1119_v14 }
  0xb0   :  { %v54_v16 = vpop.permute.xlu1 %53 }
  0xb1   :  { %vm94_vm7 = vcmp.eq.s32.totalorder %v54_v16, %v1595_v26 }
  0xb2   :  { %v1120_v18 = vsel %vm94_vm7, 1.0, %v1493_v29 }
  0xb3   :  { %1367 = vmatmul.mubr.msk.f32.gmra.mrb[2].mxu0 %vm525_vm2, %v1120_v18 }
  0xb4   :  { %v434_v19 = vpop.permute.xlu0 %433  ;;  %1369 = vmatprep.mubr.msk.f32.mxu0 %vm525_vm2, %v1121_v17 }
  0xb5   :  { %vm478_vm8 = vcmp.eq.s32.totalorder %v434_v19, %v1595_v26  ;;  %v440_v21 = vpop.permute.xlu1 %439 }
  0xb6   :  { %v1166_v20 = vsel %vm478_vm8, 1.0, %v1493_v29  ;;  %vm480_vm9 = vcmp.eq.s32.totalorder %v440_v21, %v1595_v26 }
  0xb7   :  { %1324 = vmatmul.mubr.msk.f32.vlgmr.msra.gmra.mrb[8].mxu1 %vm525_vm2, %v1166_v20  ;;  %v1168_v24 = vsel %vm480_vm9, 1.0, %v1493_v29  ;;  %vm103_vm9 = vcmp.eq.s32.totalorder %v1677_v15, %v1595_v26 }
  0xb8   :  { %v437_v22 = vpop.permute.xlu0 %436  ;;  %v1129_v55 = vsel %vm103_vm9, 1.0, %v1493_v29  ;;  %vm1043_vm9 = vcmask 523712  }
  0xb9   :  { %vm479_vm10 = vcmp.eq.s32.totalorder %v437_v22, %v1595_v26 }
  0xba   :  { %v1167_v23 = vsel %vm479_vm10, 1.0, %v1493_v29  ;;  %v60_v27 = vpop.permute.xlu1 %59 }
  0xbb   :  { %1326 = vmatprep.mubr.msk.f32.mxu1 %vm525_vm2, %v1167_v23  ;;  %vm96_vm11 = vcmp.eq.s32.totalorder %v60_v27, %v1595_v26 }
  0xbc   :  { %1327 = vmatmul.mubr.msk.f32.gmra.mrb[10].mxu1 %vm525_vm2, %v1168_v24  ;;  %v446_v28 = vpop.permute.xlu0 %445  ;;  %v1122_v30 = vsel %vm96_vm11, 1.0, %v1493_v29 }
  0xbd   :  { %1370 = vmatmul.mubr.msk.f32.gmra.mrb[4].mxu0 %vm525_vm2, %v1122_v30  ;;  %vm482_vm12 = vcmp.eq.s32.totalorder %v446_v28, %v1595_v26 }
  0xbe   :  { %v1170_v33 = vsel %vm482_vm12, 1.0, %v1493_v29 }
  0xbf   :  { %v443_v31 = vpop.permute.xlu1 %442 }
  0xc0   :  { %v449_v32 = vpop.permute.xlu0 %448  ;;  %vm481_vm13 = vcmp.eq.s32.totalorder %v443_v31, %v1595_v26 }
  0xc1   :  { %vm483_vm14 = vcmp.eq.s32.totalorder %v449_v32, %v1595_v26  ;;  %v1169_v34 = vsel %vm481_vm13, 1.0, %v1493_v29 }
  0xc2   :  { %v1171_v35 = vsel %vm483_vm14, 1.0, %v1493_v29  ;;  %1329 = vmatprep.mubr.msk.f32.mxu1 %vm525_vm2, %v1169_v34 }
  0xc3   :  { %1330 = vmatmul.mubr.msk.f32.gmra.mrb[12].mxu1 %vm525_vm2, %v1170_v33 }
  0xc4   :  { %v63_v36 = vpop.permute.xlu1 %62  ;;  %1332 = vmatprep.mubr.msk.f32.mxu1 %vm525_vm2, %v1171_v35  ;;  %v458_v43 = vpop.permute.xlu0 %457 }
  0xc5   :  { %vm97_vm15 = vcmp.eq.s32.totalorder %v63_v36, %v1595_v26  ;;  %vm486_vm0 = vcmp.eq.s32.totalorder %v458_v43, %v1595_v26 }
  0xc6   :  { %v1123_v37 = vsel %vm97_vm15, 1.0, %v1493_v29  ;;  %v1174_v48 = vsel %vm486_vm0, 1.0, %v1493_v29  ;;  %vm1015_vm0 = vcmask 261312  }
  0xc7   :  { %1372 = vmatprep.mubr.msk.f32.mxu0 %vm525_vm2, %v1123_v37 }
  0xc8   :  { %v66_v38 = vpop.permute.xlu1 %65  ;;  %v461_v46 = vpop.permute.xlu0 %460 }
  0xc9   :  { %vm98_vm3 = vcmp.eq.s32.totalorder %v66_v38, %v1595_v26  ;;  %vm487_vm6 = vcmp.eq.s32.totalorder %v461_v46, %v1595_v26 }
  0xca   :  { %v1124_v40 = vsel %vm98_vm3, 1.0, %v1493_v29  ;;  %v1175_v49 = vsel %vm487_vm6, 1.0, %v1493_v29  ;;  %vm1022_vm6 = vcmask 326912  }
  0xcb   :  { %1373 = vmatmul.mubr.msk.f32.gmra.mrb[6].mxu0 %vm525_vm2, %v1124_v40 }
  0xcc   :  { %1375 = vmatprep.mubr.msk.f32.mxu0 %vm525_vm2, %v1125_v39  ;;  %v470_v57 = vpop.permute.xlu0 %469 }
  0xcd   :  { %v452_v41 = vpop.permute.xlu1 %451  ;;  %vm490_vm13 = vcmp.eq.s32.totalorder %v470_v57, %v1595_v26 }
  0xce   :  { %vm484_vm4 = vcmp.eq.s32.totalorder %v452_v41, %v1595_v26  ;;  %v1178_v0 = vsel %vm490_vm13, 1.0, %v1493_v29  ;;  %vm1071_vm13 = vcmask 786112  }
  0xcf   :  { %v1172_v42 = vsel %vm484_vm4, 1.0, %v1493_v29 }
  0xd0   :  { %1333 = vmatmul.mubr.msk.f32.gmra.mrb[14].mxu1 %vm525_vm2, %v1172_v42  ;;  %v473_v61 = vpop.permute.xlu0 %472 }
  0xd1   :  { %vm491_vm14 = vcmp.eq.s32.totalorder %v473_v61, %v1595_v26 }
  0xd2   :  { %v72_v44 = vpop.permute.xlu1 %71  ;;  %v1179_v1 = vsel %vm491_vm14, 1.0, %v1493_v29  ;;  %vm1078_vm14 = vcmask 851712  }
  0xd3   :  { %vm100_vm5 = vcmp.eq.s32.totalorder %v72_v44, %v1595_v26 }
  0xd4   :  { %v1126_v45 = vsel %vm100_vm5, 1.0, %v1493_v29  ;;  %vm1008_vm5 = vcmask 195712  }
  0xd5   :  { %1376 = vmatmul.mubr.msk.f32.gmra.mrb[8].mxu0 %vm525_vm2, %v1126_v45 }
  0xd7   :  { %v455_v47 = vpop.permute.xlu1 %454 }
  0xd8   :  { %vm485_vm7 = vcmp.eq.s32.totalorder %v455_v47, %v1595_v26 }
  0xd9   :  { %v1173_v50 = vsel %vm485_vm7, 1.0, %v1493_v29  ;;  %vm1029_vm7 = vcmask 392512  }
  0xda   :  { %1335 = vmatprep.mubr.msk.f32.mxu1 %vm525_vm2, %v1173_v50 }
  0xdb   :  { %1336 = vmatmul.mubr.msk.f32.gmra.mrb[16].mxu1 %vm525_vm2, %v1174_v48 }
  0xdc   :  { %v75_v51 = vpop.permute.xlu1 %74  ;;  %1338 = vmatprep.mubr.msk.f32.mxu1 %vm525_vm2, %v1175_v49 }
  0xdd   :  { %vm101_vm8 = vcmp.eq.s32.totalorder %v75_v51, %v1595_v26 }
  0xde   :  { %v1127_v52 = vsel %vm101_vm8, 1.0, %v1493_v29  ;;  %vm1036_vm8 = vcmask 458112  }
  0xdf   :  { %1378 = vmatprep.mubr.msk.f32.mxu0 %vm525_vm2, %v1127_v52 }
  0xe0   :  { %v78_v53 = vpop.permute.xlu1 %77 }
  0xe1   :  { %vm102_vm10 = vcmp.eq.s32.totalorder %v78_v53, %v1595_v26 }
  0xe2   :  { %v1128_v54 = vsel %vm102_vm10, 1.0, %v1493_v29  ;;  %vm1050_vm10 = vcmask 589312  }
  0xe3   :  { %1379 = vmatmul.mubr.msk.f32.gmra.mrb[10].mxu0 %vm525_vm2, %v1128_v54 }
  0xe4   :  { %1381 = vmatprep.mubr.msk.f32.mxu0 %vm525_vm2, %v1129_v55 }
  0xe5   :  { %v464_v56 = vpop.permute.xlu1 %463 }
  0xe6   :  { %vm488_vm11 = vcmp.eq.s32.totalorder %v464_v56, %v1595_v26 }
  0xe7   :  { %v1176_v58 = vsel %vm488_vm11, 1.0, %v1493_v29  ;;  %vm1057_vm11 = vcmask 654912  }
  0xe8   :  { %1339 = vmatmul.mubr.msk.f32.gmra.mrb[18].mxu1 %vm525_vm2, %v1176_v58 }
  0xea   :  { %v84_v59 = vpop.permute.xlu1 %83 }
  0xeb   :  { %vm104_vm12 = vcmp.eq.s32.totalorder %v84_v59, %v1595_v26 }
  0xec   :  { %v1130_v60 = vsel %vm104_vm12, 1.0, %v1493_v29  ;;  %vm1064_vm12 = vcmask 720512  }
  0xed   :  { %1382 = vmatmul.mubr.msk.f32.gmra.mrb[12].mxu0 %vm525_vm2, %v1130_v60 }
  0xef   :  { %v467_v62 = vpop.permute.xlu1 %466 }
  0xf0   :  { %vm489_vm15 = vcmp.eq.s32.totalorder %v467_v62, %v1595_v26 }
  0xf1   :  { %v1177_v63 = vsel %vm489_vm15, 1.0, %v1493_v29  ;;  %vm1085_vm15 = vcmask 917312  }
  0xf2   :  { %1341 = vmatprep.mubr.msk.f32.mxu1 %vm525_vm2, %v1177_v63 }
  0xf3   :  { %1342 = vmatmul.mubr.msk.f32.gmra.mrb[20].mxu1 %vm525_vm2, %v1178_v0 }
  0xf4   :  { %v87_v2 = vpop.permute.xlu1 %86  ;;  %1344 = vmatprep.mubr.msk.f32.mxu1 %vm525_vm2, %v1179_v1 }
  0xf5   :  { %vm105_vm1 = vcmp.eq.s32.totalorder %v87_v2, %v1595_v26 }
  0xf6   :  { %v1131_v3 = vsel %vm105_vm1, 1.0, %v1493_v29  ;;  %vm1092_vm1 = vcmask 982912  }
  0xf7   :  { %1384 = vmatprep.mubr.msk.f32.mxu0 %vm525_vm2, %v1131_v3 }
  0xf8   :  { %v90_v4 = vpop.permute.xlu1 %89 }
  0xf9   :  { %vm106_vm3 = vcmp.eq.s32.totalorder %v90_v4, %v1595_v26 }
  0xfa   :  { %v1132_v5 = vsel %vm106_vm3, 1.0, %v1493_v29  ;;  %vm1099_vm3 = vcmask 1048512  }
  0xfb   :  { %1385 = vmatmul.mubr.msk.f32.gmra.mrb[14].mxu0 %vm525_vm2, %v1132_v5 }
  0xfd   :  { %v476_v6 = vpop.permute.xlu1 %475 }
  0xfe   :  { %vm492_vm4 = vcmp.eq.s32.totalorder %v476_v6, %v1595_v26 }
  0xff   :  { %v1180_v7 = vsel %vm492_vm4, 1.0, %v1493_v29 }
 0x100   :  { %1345 = vmatmul.mubr.msk.f32.gmra.mrb[22].mxu1 %vm525_vm2, %v1180_v7  ;;  %vm1001_vm2 = vcmask 130112  }
 0x15b   :  { %v1297_v8 = vpop.f32.mrb[0].mxu1 }
 0x15c   :  { %v390_v9 = vpop.f32.mrb[1].mxu1 }
 0x165   :  { %v1300_v10 = vpop.f32.mrb[2].mxu1 }
 0x166   :  { %v400_v11 = vpop.f32.mrb[3].mxu1 }
 0x16d   :  { %v1764_v12 = vpop.f32.mrb[4].mxu1 }
 0x16e   :  { %v1766_v13 = vpop.f32.mrb[5].mxu1 }
 0x175   :  { %v1768_v14 = vpop.f32.mrb[6].mxu1 }
 0x176   :  { %v1770_v15 = vpop.f32.mrb[7].mxu1 }
 0x17a   :  { %v1365_v16 = vpop.f32.mrb[0].mxu0 }
 0x17b   :  { %v833_v17 = vpop.f32.mrb[1].mxu0 }
 0x186   :  { %v1368_v18 = vpop.f32.mrb[2].mxu0 }
 0x187   :  { %v843_v19 = vpop.f32.mrb[3].mxu0 }
 0x18a   :  { %v1325_v20 = vpop.f32.mrb[8].mxu1 }
 0x18b   :  { %v913_v29 = vsub.f32 %v1365_v16, %v1325_v20  ;;  %v640_v21 = vpop.f32.mrb[9].mxu1 }
 0x18c   :  { %v912_v22 = vsub.f32 %v833_v17, %v640_v21 }
 0x18d   :  { %v929_v23 = vand.u32 2147483647, %v913_v29 }
 0x18e   :  { %v928_v24 = vand.u32 2147483647, %v912_v22 }
 0x18f   :  { %946 = vadd.xlane.f32.xlu1 %v929_v23  ;;  %v1328_v27 = vpop.f32.mrb[10].mxu1 }
 0x190   :  { %v915_v28 = vsub.f32 %v1368_v18, %v1328_v27  ;;  %944 = vadd.xlane.f32.xlu0 %v928_v24  ;;  %v650_v30 = vpop.f32.mrb[11].mxu1  ;;  %v1371_v32 = vpop.f32.mrb[4].mxu0 }
 0x191   :  { %v914_v31 = vsub.f32 %v843_v19, %v650_v30  ;;  %v853_v34 = vpop.f32.mrb[5].mxu0 }
 0x192   :  { %v931_v33 = vand.u32 2147483647, %v915_v28 }
 0x193   :  { %v930_v35 = vand.u32 2147483647, %v914_v31  ;;  %v1777_v31 = vshrl.u32 %v41_v25, 7 }
 0x194   :  { %950 = vadd.xlane.f32.xlu0 %v931_v33 }
 0x196   :  { %v1331_v36 = vpop.f32.mrb[12].mxu1 }
 0x197   :  { %v917_v37 = vsub.f32 %v1371_v32, %v1331_v36  ;;  %v660_v38 = vpop.f32.mrb[13].mxu1  ;;  %v996_v32 = vadd.s32 4294967288, %v1595_v26 }
 0x198   :  { %948 = vadd.xlane.f32.xlu0 %v930_v35  ;;  %v916_v39 = vsub.f32 %v853_v34, %v660_v38  ;;  %v1010_v38 = vadd.s32 4294967272, %v1595_v26 }
 0x199   :  { %v933_v40 = vand.u32 2147483647, %v917_v37  ;;  %v999_v34 = vsub.s32 %v996_v32, %v1777_v31  ;;  %v1017_v37 = vadd.s32 4294967264, %v1595_v26 }
 0x19a   :  { %v932_v41 = vand.u32 2147483647, %v916_v39 }
 0x19c   :  { %954 = vadd.xlane.f32.xlu0 %v933_v40  ;;  %952 = vadd.xlane.f32.xlu1 %v932_v41 }
 0x19e   :  { %v1374_v42 = vpop.f32.mrb[6].mxu0 }
 0x19f   :  { %v863_v43 = vpop.f32.mrb[7].mxu0 }
 0x1a3   :  { %v1334_v44 = vpop.f32.mrb[14].mxu1 }
 0x1a4   :  { %v919_v45 = vsub.f32 %v1374_v42, %v1334_v44  ;;  %v670_v46 = vpop.f32.mrb[15].mxu1  ;;  %v1020_v42 = vsub.s32 %v1017_v37, %v1777_v31  ;;  %v1013_v44 = vsub.s32 %v1010_v38, %v1777_v31 }
 0x1a5   :  { %v918_v47 = vsub.f32 %v863_v43, %v670_v46  ;;  %v1031_v43 = vadd.s32 4294967248, %v1595_v26 }
 0x1a6   :  { %v935_v48 = vand.u32 2147483647, %v919_v45  ;;  %v1024_v45 = vadd.s32 4294967256, %v1595_v26 }
 0x1a7   :  { %v934_v49 = vand.u32 2147483647, %v918_v47 }
 0x1a8   :  { %v1377_v50 = vpop.f32.mrb[8].mxu0  ;;  %958 = vadd.xlane.f32.xlu0 %v935_v48 }
 0x1a9   :  { %v879_v51 = vadd.f32 %v1377_v50, %v1297_v8  ;;  %v873_v52 = vpop.f32.mrb[9].mxu0  ;;  %956 = vadd.xlane.f32.xlu1 %v934_v49 }
 0x1aa   :  { %v874_v53 = vadd.f32 %v873_v52, %v390_v9  ;;  %v1045_v52 = vadd.s32 4294967232, %v1595_v26 }
 0x1ae   :  { %v1337_v54 = vpop.f32.mrb[16].mxu1 }
 0x1af   :  { %v921_v55 = vsub.f32 %v879_v51, %v1337_v54  ;;  %v680_v56 = vpop.f32.mrb[17].mxu1  ;;  %v1034_v51 = vsub.s32 %v1031_v43, %v1777_v31  ;;  %v1027_v54 = vsub.s32 %v1024_v45, %v1777_v31 }
 0x1b0   :  { %v920_v57 = vsub.f32 %v874_v53, %v680_v56 }
 0x1b1   :  { %v937_v58 = vand.u32 2147483647, %v921_v55  ;;  %v1038_v55 = vadd.s32 4294967240, %v1595_v26 }
 0x1b2   :  { %v936_v59 = vand.u32 2147483647, %v920_v57 }
 0x1b3   :  { %962 = vadd.xlane.f32.xlu0 %v937_v58 }
 0x1b4   :  { %960 = vadd.xlane.f32.xlu1 %v936_v59 }
 0x1b6   :  { %v1380_v60 = vpop.f32.mrb[10].mxu0 }
 0x1b7   :  { %v889_v61 = vadd.f32 %v1380_v60, %v1300_v10  ;;  %v883_v62 = vpop.f32.mrb[11].mxu0 }
 0x1b8   :  { %v884_v63 = vadd.f32 %v883_v62, %v400_v11  ;;  %v1059_v62 = vadd.s32 4294967216, %v1595_v26 }
 0x1bb   :  { %v1340_v0 = vpop.f32.mrb[18].mxu1 }
 0x1bc   :  { %v923_v1 = vsub.f32 %v889_v61, %v1340_v0  ;;  %v690_v2 = vpop.f32.mrb[19].mxu1  ;;  %v1048_v61 = vsub.s32 %v1045_v52, %v1777_v31  ;;  %v1041_v0 = vsub.s32 %v1038_v55, %v1777_v31 }
 0x1bd   :  { %v922_v3 = vsub.f32 %v884_v63, %v690_v2 }
 0x1be   :  { %v939_v4 = vand.u32 2147483647, %v923_v1  ;;  %v1052_v1 = vadd.s32 4294967224, %v1595_v26 }
 0x1bf   :  { %v938_v5 = vand.u32 2147483647, %v922_v3 }
 0x1c0   :  { %v1383_v6 = vpop.f32.mrb[12].mxu0  ;;  %966 = vadd.xlane.f32.xlu0 %v939_v4 }
 0x1c1   :  { %v899_v7 = vadd.f32 %v1383_v6, %v1764_v12  ;;  %v893_v8 = vpop.f32.mrb[13].mxu0  ;;  %964 = vadd.xlane.f32.xlu1 %v938_v5 }
 0x1c2   :  { %v894_v9 = vadd.f32 %v893_v8, %v1766_v13  ;;  %v1073_v8 = vadd.s32 4294967200, %v1595_v26 }
 0x1c6   :  { %v1343_v16 = vpop.f32.mrb[20].mxu1 }
 0x1c7   :  { %v925_v17 = vsub.f32 %v899_v7, %v1343_v16  ;;  %v700_v18 = vpop.f32.mrb[21].mxu1  ;;  %v1062_v7 = vsub.s32 %v1059_v62, %v1777_v31  ;;  %v1055_v16 = vsub.s32 %v1052_v1, %v1777_v31 }
 0x1c8   :  { %v924_v10 = vsub.f32 %v894_v9, %v700_v18 }
 0x1c9   :  { %v941_v19 = vand.u32 2147483647, %v925_v17  ;;  %v1066_v17 = vadd.s32 4294967208, %v1595_v26 }
 0x1ca   :  { %v940_v11 = vand.u32 2147483647, %v924_v10 }
 0x1cb   :  { %970 = vadd.xlane.f32.xlu0 %v941_v19 }
 0x1cc   :  { %968 = vadd.xlane.f32.xlu1 %v940_v11 }
 0x1ce   :  { %v1386_v20 = vpop.f32.mrb[14].mxu0 }
 0x1cf   :  { %v909_v29 = vadd.f32 %v1386_v20, %v1768_v14  ;;  %v903_v21 = vpop.f32.mrb[15].mxu0  ;;  %v1003_v14 = vadd.s32 4294967280, %v1595_v26 }
 0x1d0   :  { %v904_v22 = vadd.f32 %v903_v21, %v1770_v15  ;;  %v994_v15 = vsub.s32 %v1595_v26, %v1777_v31 }
 0x1d1   :  { %v1006_v36 = vsub.s32 %v1003_v14, %v1777_v31 }
 0x1d3   :  { %v1346_v23 = vpop.f32.mrb[22].mxu1 }
 0x1d4   :  { %v927_v12 = vsub.f32 %v909_v29, %v1346_v23  ;;  %v710_v24 = vpop.f32.mrb[23].mxu1  ;;  %v1076_v29 = vsub.s32 %v1073_v8, %v1777_v31  ;;  %v1080_v23 = vadd.s32 4294967192, %v1595_v26 }
 0x1d5   :  { %v926_v27 = vsub.f32 %v904_v22, %v710_v24  ;;  %v1069_v22 = vsub.s32 %v1066_v17, %v1777_v31  ;;  %v1087_v24 = vadd.s32 4294967184, %v1595_v26 }
 0x1d6   :  { %v943_v28 = vand.u32 2147483647, %v927_v12  ;;  %v1083_v14 = vsub.s32 %v1080_v23, %v1777_v31 }
 0x1d7   :  { %v942_v13 = vand.u32 2147483647, %v926_v27 }
 0x1d8   :  { %974 = vadd.xlane.f32.xlu0 %v943_v28  ;;  %v1094_v28 = vadd.s32 4294967176, %v1595_v26 }
 0x1d9   :  { %972 = vadd.xlane.f32.xlu1 %v942_v13 }
 0x21c   :  { %v947_v35 = vpop.xlane.xlu1 %946 }
 0x21d   :  { %v945_v30 = vpop.xlane.xlu0 %944  ;;  %v1000_v25 = vrot.slane %v947_v35, %v999_v34  ;;  %v1090_v34 = vsub.s32 %v1087_v24, %v1777_v31  ;;  %v1097_v35 = vsub.s32 %v1094_v28, %v1777_v31 }
 0x21e   :  { %v995_v40 = vrot.slane %v945_v30, %v994_v15 }
 0x220   :  { %v1002_v47 = vsel %vm1001_vm2, %v1000_v25, %v995_v40 }
 0x221   :  { %v951_v33 = vpop.xlane.xlu0 %950 }
 0x222   :  { %v1014_v53 = vrot.slane %v951_v33, %v1013_v44 }
 0x225   :  { %v949_v39 = vpop.xlane.xlu0 %948 }
 0x226   :  { %v1007_v41 = vrot.slane %v949_v39, %v1006_v36 }
 0x228   :  { %v1009_v48 = vsel %vm1008_vm5, %v1007_v41, %v1002_v47 }
 0x229   :  { %v953_v46 = vpop.xlane.xlu1 %952  ;;  %v955_v49 = vpop.xlane.xlu0 %954  ;;  %v1016_v57 = vsel %vm1015_vm0, %v1014_v53, %v1009_v48 }
 0x22a   :  { %v1021_v50 = vrot.slane %v953_v46, %v1020_v42  ;;  %v1028_v63 = vrot.slane %v955_v49, %v1027_v54 }
 0x22c   :  { %v1023_v58 = vsel %vm1022_vm6, %v1021_v50, %v1016_v57 }
 0x22d   :  { %v1030_v3 = vsel %vm1029_vm7, %v1028_v63, %v1023_v58 }
 0x235   :  { %v959_v59 = vpop.xlane.xlu0 %958 }
 0x236   :  { %v957_v56 = vpop.xlane.xlu1 %956  ;;  %v1042_v9 = vrot.slane %v959_v59, %v1041_v0 }
 0x237   :  { %v1035_v60 = vrot.slane %v957_v56, %v1034_v51 }
 0x239   :  { %v1037_v4 = vsel %vm1036_vm8, %v1035_v60, %v1030_v3 }
 0x23a   :  { %v1044_v10 = vsel %vm1043_vm9, %v1042_v9, %v1037_v4 }
 0x240   :  { %v963_v5 = vpop.xlane.xlu0 %962 }
 0x241   :  { %v961_v2 = vpop.xlane.xlu1 %960  ;;  %v1056_v21 = vrot.slane %v963_v5, %v1055_v16 }
 0x242   :  { %v1049_v6 = vrot.slane %v961_v2, %v1048_v61 }
 0x244   :  { %v1051_v19 = vsel %vm1050_vm10, %v1049_v6, %v1044_v10 }
 0x245   :  { %v1058_v27 = vsel %vm1057_vm11, %v1056_v21, %v1051_v19 }
 0x24d   :  { %v967_v11 = vpop.xlane.xlu0 %966 }
 0x24e   :  { %v965_v18 = vpop.xlane.xlu1 %964  ;;  %v1070_v33 = vrot.slane %v967_v11, %v1069_v22 }
 0x24f   :  { %v1063_v20 = vrot.slane %v965_v18, %v1062_v7 }
 0x251   :  { %v1065_v13 = vsel %vm1064_vm12, %v1063_v20, %v1058_v27 }
 0x252   :  { %v1072_v15 = vsel %vm1071_vm13, %v1070_v33, %v1065_v13 }
 0x258   :  { %v971_v30 = vpop.xlane.xlu0 %970 }
 0x259   :  { %v969_v12 = vpop.xlane.xlu1 %968  ;;  %v1084_v38 = vrot.slane %v971_v30, %v1083_v14 }
 0x25a   :  { %v1077_v32 = vrot.slane %v969_v12, %v1076_v29 }
 0x25c   :  { %v1079_v36 = vsel %vm1078_vm14, %v1077_v32, %v1072_v15 }
 0x25d   :  { %v1086_v40 = vsel %vm1085_vm15, %v1084_v38, %v1079_v36 }
 0x265   :  { %v975_v37 = vpop.xlane.xlu0 %974 }
 0x266   :  { %v973_v39 = vpop.xlane.xlu1 %972  ;;  %v1098_v25 = vrot.slane %v975_v37, %v1097_v35 }
 0x267   :  { %v1091_v26 = vrot.slane %v973_v39, %v1090_v34 }
 0x269   :  { %v1093_v41 = vsel %vm1092_vm1, %v1091_v26, %v1086_v40 }
 0x26a   :  { %v1100_v42 = vsel %vm1099_vm3, %v1098_v25, %v1093_v41 }
 0x26b   :  { %1102 = vst [vmem:[#allocation2] sm:$0x1] %v1100_v42 }
 0x26c   :  { %1477 = shalt.err (!%p1474_p4)
}
 0x26d   :  { %s1478_s12 = scalar_lea.hbm %s1826_s3, 16 }
 0x26e   :  { %p1479_p5 = scmp.ne.s32.totalorder %s1826_s3, %s1478_s12  ;;  %p1482_p6 = scmp.lt.u32.totalorder %s1478_s12, %s1826_s3 }
 0x270   :  { %p1484_p7 = pnand %p1482_p6, %p1479_p5 }
 0x272   :  { %1487 = shalt.err (!%p1484_p7)
}
 0x273   :  { %1112 = dma.vmem_to_hbm [thread:$0]  %s1110_s7, 16, %s1826_s3, [#allocation3]  }
 0x274   :  { %1488 = dma.done.wait [#allocation3], 16  }
 0x275   :  { %1489 = vsyncadd [#allocation3], 4294967280 }
 0x276   :  { %1116 = vsyncpa [#allocation3], 1 }

</bundles_post_ra>
